<compile_context>
chip_gen: v6e
topology: v6e:2x2x1
jax: 0.10.0
libtpu: 0.0.40
codegen_flags: <defaults>
</compile_context>

<pallas_src>
import jax
import jax.numpy as jnp
from jax.experimental import pallas as pl
from jax.experimental.pallas import tpu as pltpu

LATENT_DIM = 10
COND_DIM = 16
IN_DIM = LATENT_DIM + COND_DIM        # 26
HIDDEN = 128
OUT_DIM = 2
LEAKY_SLOPE = 0.01                    # nn.LeakyReLU default negative_slope


def _round_up(x, m):
    return ((x + m - 1) // m) * m


def _leaky_relu(x, slope=LEAKY_SLOPE):
    # For 0 < slope < 1:  max(x, slope*x) == LeakyReLU(x).  2 VALU ops.
    return jnp.maximum(x, slope * x)


def _generator_kernel(x_ref, w1_ref, b1_ref, w2_ref, b2_ref, w3_ref, b3_ref,
                      o_ref):
    wdtype = w1_ref.dtype
    # In-kernel downcast of the f32 input tile (cheap VPU op hidden under the
    # MXU work; avoids a separate wrapper-side cast pass over HBM).
    x = x_ref[...].astype(wdtype)                                   # [tb, 26]

    # Layer 1: one fused matmul over the concatenated [z | bits] features.
    h1 = jnp.dot(x, w1_ref[...], preferred_element_type=jnp.float32)
    h1 = _leaky_relu(h1 + b1_ref[...])                              # f32 path

    # Layer 2: Linear(128 -> 128) + LeakyReLU (bf16 operands, f32 accumulate).
    # TODO(synk): on v6e/v7x a bf16 bias+activation path would halve VALU work;
    # kept f32 here so the same kernel is exact-enough on v5e (no bf16 VPU).
    h2 = jnp.dot(h1.astype(wdtype), w2_ref[...],
                 preferred_element_type=jnp.float32)
    h2 = _leaky_relu(h2 + b2_ref[...])

    # Layer 3: Linear(128 -> 2).
    out = jnp.dot(h2.astype(wdtype), w3_ref[...],
                  preferred_element_type=jnp.float32)
    o_ref[...] = (out + b3_ref[...]).astype(o_ref.dtype)


def generator_forward(z, bits, params, *, block_b=2048):
    """Pallas forward pass. z: [B, latent_dim], bits: [B, cond_dim] (f32)."""
    B = z.shape[0]
    # Single concat pass (kept f32; the bf16 cast happens inside the kernel).
    x = jnp.concatenate([z, bits], axis=1)                          # [B, 26]

    w1, b1 = params["w1"], params["b1"]
    w2, b2 = params["w2"], params["b2"]
    w3, b3 = params["w3"], params["b3"]

    # Batch tile: large enough to amortize the ~0.35 us per-grid-step overhead,
    # multiple of 16 for bf16 sublane packing, and — when the batch allows —
    # clamped so the grid has >= 2 steps (both v7x TensorCores get work).
    # Per-step VMEM (2x-buffered lane-padded f32 in/out tiles + f32 h1/h2)
    # stays ~8 MiB at tb=2048: safe under v5e's 16 MiB scoped default and far
    # under v7x's 64 MiB physical VMEM.
    tb = min(_round_up(block_b, 16), _round_up(B, 8))
    if B > 16:
        tb = min(tb, _round_up(pl.cdiv(B, 2), 16))
    tb = max(tb, 8)
    grid = (pl.cdiv(B, tb),)

    w_itemsize = jnp.dtype(w1.dtype).itemsize
    flops = 2 * B * (IN_DIM * HIDDEN + HIDDEN * HIDDEN + HIDDEN * OUT_DIM)
    bytes_accessed = (
        B * IN_DIM * jnp.dtype(x.dtype).itemsize                # input tiles
        + B * OUT_DIM * 4                                       # f32 output
        + (w1.size + w2.size + w3.size) * w_itemsize            # weights
        + (b1.size + b2.size + b3.size) * 4)                    # f32 biases

    # Per-grid-step batch tiles: last dim is the full feature extent, so the
    # (8,128) rule is satisfied; tb is a multiple of 8 for the sublane dim.
    row_spec = lambda cols: pl.BlockSpec((tb, cols), lambda i: (i, 0))
    # Constant index_map -> weights/biases stay VMEM-resident across steps.
    resident = lambda a: pl.BlockSpec(a.shape, lambda i: (0,) * a.ndim)

    return pl.pallas_call(
        _generator_kernel,
        out_shape=jax.ShapeDtypeStruct((B, OUT_DIM), jnp.float32),
        grid=grid,
        in_specs=[
            row_spec(IN_DIM),                                  # x = [z | bits]
            resident(w1), resident(b1),
            resident(w2), resident(b2),
            resident(w3), resident(b3),
        ],
        out_specs=row_spec(OUT_DIM),
        compiler_params=pltpu.CompilerParams(
            dimension_semantics=("parallel",)),
        cost_estimate=pl.CostEstimate(
            flops=flops, transcendentals=0, bytes_accessed=bytes_accessed),
    )(x, w1, b1, w2, b2, w3, b3)


def init_params(key, dtype=jnp.bfloat16):
    """Synthetic parameters matching the PyTorch module shapes.

    Weights stored as [in, out] (transposed vs torch.nn.Linear) in bf16;
    biases stay f32 (added on the f32 accumulator inside the kernel).
    """
    k1, k2, k3, k4, k5, k6 = jax.random.split(key, 6)

    def uinit(k, fan_in, shape):
        bound = 1.0 / jnp.sqrt(fan_in)
        return jax.random.uniform(k, shape, jnp.float32, -bound, bound)

    return {
        "w1": uinit(k1, IN_DIM, (IN_DIM, HIDDEN)).astype(dtype),
        "b1": uinit(k2, IN_DIM, (1, HIDDEN)),
        "w2": uinit(k3, HIDDEN, (HIDDEN, HIDDEN)).astype(dtype),
        "b2": uinit(k4, HIDDEN, (1, HIDDEN)),
        "w3": uinit(k5, HIDDEN, (HIDDEN, OUT_DIM)).astype(dtype),
        "b3": uinit(k6, HIDDEN, (1, OUT_DIM)),
    }


def _reference_forward(z, bits, params):
    """Pure-JAX reference on the same bf16-operand / f32-accumulate path."""
    wdtype = params["w1"].dtype
    x = jnp.concatenate([z, bits], axis=1).astype(wdtype)
    h1 = _leaky_relu(
        jnp.dot(x, params["w1"], preferred_element_type=jnp.float32)
        + params["b1"])
    h2 = _leaky_relu(
        jnp.dot(h1.astype(wdtype), params["w2"],
                preferred_element_type=jnp.float32) + params["b2"])
    return (jnp.dot(h2.astype(wdtype), params["w3"],
                    preferred_element_type=jnp.float32) + params["b3"])


if __name__ == "__main__":
    key = jax.random.PRNGKey(0)
    kp, kz, kb = jax.random.split(key, 3)

    B = 8
    params = init_params(kp)
    z = jax.random.normal(kz, (B, LATENT_DIM), jnp.float32)
    # "bits" conditioning vector: synthetic 0/1 values like bit labels.
    bits = jax.random.bernoulli(kb, 0.5, (B, COND_DIM)).astype(jnp.float32)

    out = jax.jit(generator_forward)(z, bits, params)
    out = jax.block_until_ready(out)

    ref = _reference_forward(z, bits, params)
    assert out.shape == (B, OUT_DIM), out.shape
    err = jnp.max(jnp.abs(out - ref))
    assert jnp.allclose(out, ref, atol=1e-3, rtol=1e-3), f"max abs err = {err}"

    print("KERNEL_OK")
</pallas_src>

<mosaic_0001>
module attributes {stable_mosaic.version = 11 : i64} {
  func.func @_generator_kernel(%arg0: i32, %arg1: memref<8x26xf32, #tpu.memory_space<vmem>>, %arg2: memref<26x128xbf16, #tpu.memory_space<vmem>>, %arg3: memref<1x128xf32, #tpu.memory_space<vmem>>, %arg4: memref<128x128xbf16, #tpu.memory_space<vmem>>, %arg5: memref<1x128xf32, #tpu.memory_space<vmem>>, %arg6: memref<128x2xbf16, #tpu.memory_space<vmem>>, %arg7: memref<1x2xf32, #tpu.memory_space<vmem>>, %arg8: memref<8x2xf32, #tpu.memory_space<vmem>>) attributes {dimension_semantics = [#tpu.dimension_semantics<parallel>], iteration_bounds = array<i64: 1>, scalar_prefetch = 0 : i64, scratch_operands = 0 : i64, tpu.core_type = #tpu.core_type<tc>, window_params = [{transform_indices = @transform_0, window_bounds = array<i64: 8, 26>}, {pipeline_mode = #tpu.pipeline_mode<synchronous>, transform_indices = @transform_1, window_bounds = array<i64: 26, 128>}, {pipeline_mode = #tpu.pipeline_mode<synchronous>, transform_indices = @transform_2, window_bounds = array<i64: 1, 128>}, {pipeline_mode = #tpu.pipeline_mode<synchronous>, transform_indices = @transform_3, window_bounds = array<i64: 128, 128>}, {pipeline_mode = #tpu.pipeline_mode<synchronous>, transform_indices = @transform_4, window_bounds = array<i64: 1, 128>}, {pipeline_mode = #tpu.pipeline_mode<synchronous>, transform_indices = @transform_5, window_bounds = array<i64: 128, 2>}, {pipeline_mode = #tpu.pipeline_mode<synchronous>, transform_indices = @transform_6, window_bounds = array<i64: 1, 2>}, {transform_indices = @transform_7, window_bounds = array<i64: 8, 2>}]} {
    %c0 = arith.constant 0 : index
    %c0_0 = arith.constant 0 : index
    %0 = vector.load %arg1[%c0, %c0_0] : memref<8x26xf32, #tpu.memory_space<vmem>>, vector<8x26xf32>
    %1 = arith.truncf %0 : vector<8x26xf32> to vector<8x26xbf16>
    %c0_1 = arith.constant 0 : index
    %c0_2 = arith.constant 0 : index
    %2 = vector.load %arg2[%c0_1, %c0_2] : memref<26x128xbf16, #tpu.memory_space<vmem>>, vector<26x128xbf16>
    %cst = arith.constant dense<0.000000e+00> : vector<8x128xf32>
    %3 = tpu.matmul %1, %2, %cst {dimension_numbers = #tpu.dot_dimension_numbers<[1], [0], [0], [1], [0, 0, 1, 1], [], []>} : vector<8x26xbf16>, vector<26x128xbf16>, vector<8x128xf32> -> vector<8x128xf32>
    %c0_3 = arith.constant 0 : index
    %c0_4 = arith.constant 0 : index
    %4 = vector.load %arg3[%c0_3, %c0_4] : memref<1x128xf32, #tpu.memory_space<vmem>>, vector<1x128xf32>
    %5 = vector.broadcast %4 : vector<1x128xf32> to vector<8x128xf32>
    %6 = arith.addf %3, %5 : vector<8x128xf32>
    %cst_5 = arith.constant 0.00999999977 : f32
    %7 = vector.broadcast %cst_5 : f32 to vector<8x128xf32>
    %8 = arith.mulf %7, %6 : vector<8x128xf32>
    %9 = arith.maximumf %6, %8 : vector<8x128xf32>
    %10 = arith.truncf %9 : vector<8x128xf32> to vector<8x128xbf16>
    %c0_6 = arith.constant 0 : index
    %c0_7 = arith.constant 0 : index
    %11 = vector.load %arg4[%c0_6, %c0_7] : memref<128x128xbf16, #tpu.memory_space<vmem>>, vector<128x128xbf16>
    %cst_8 = arith.constant dense<0.000000e+00> : vector<8x128xf32>
    %12 = tpu.matmul %10, %11, %cst_8 {dimension_numbers = #tpu.dot_dimension_numbers<[1], [0], [0], [1], [0, 0, 1, 1], [], []>} : vector<8x128xbf16>, vector<128x128xbf16>, vector<8x128xf32> -> vector<8x128xf32>
    %c0_9 = arith.constant 0 : index
    %c0_10 = arith.constant 0 : index
    %13 = vector.load %arg5[%c0_9, %c0_10] : memref<1x128xf32, #tpu.memory_space<vmem>>, vector<1x128xf32>
    %14 = vector.broadcast %13 : vector<1x128xf32> to vector<8x128xf32>
    %15 = arith.addf %12, %14 : vector<8x128xf32>
    %cst_11 = arith.constant 0.00999999977 : f32
    %16 = vector.broadcast %cst_11 : f32 to vector<8x128xf32>
    %17 = arith.mulf %16, %15 : vector<8x128xf32>
    %18 = arith.maximumf %15, %17 : vector<8x128xf32>
    %19 = arith.truncf %18 : vector<8x128xf32> to vector<8x128xbf16>
    %c0_12 = arith.constant 0 : index
    %c0_13 = arith.constant 0 : index
    %20 = vector.load %arg6[%c0_12, %c0_13] : memref<128x2xbf16, #tpu.memory_space<vmem>>, vector<128x2xbf16>
    %cst_14 = arith.constant dense<0.000000e+00> : vector<8x2xf32>
    %21 = tpu.matmul %19, %20, %cst_14 {dimension_numbers = #tpu.dot_dimension_numbers<[1], [0], [0], [1], [0, 0, 1, 1], [], []>} : vector<8x128xbf16>, vector<128x2xbf16>, vector<8x2xf32> -> vector<8x2xf32>
    %c0_15 = arith.constant 0 : index
    %c0_16 = arith.constant 0 : index
    %22 = vector.load %arg7[%c0_15, %c0_16] : memref<1x2xf32, #tpu.memory_space<vmem>>, vector<1x2xf32>
    %23 = vector.broadcast %22 : vector<1x2xf32> to vector<8x2xf32>
    %24 = arith.addf %21, %23 : vector<8x2xf32>
    %c0_17 = arith.constant 0 : index
    %c0_18 = arith.constant 0 : index
    %25 = vector.load %arg8[%c0_17, %c0_18] : memref<8x2xf32, #tpu.memory_space<vmem>>, vector<8x2xf32>
    tpu.vector_store %arg8[%c0_17, %c0_18], %24 {strides = array<i32>} : memref<8x2xf32, #tpu.memory_space<vmem>>, vector<8x2xf32>,
    return
  }
  func.func @transform_0(%arg0: i32) -> (i32, i32) {
    %c0_i32 = arith.constant 0 : i32
    %c0_i32_0 = arith.constant 0 : i32
    return %arg0, %c0_i32 : i32, i32
  }
  func.func @transform_1(%arg0: i32) -> (i32, i32) {
    %c0_i32 = arith.constant 0 : i32
    %c0_i32_0 = arith.constant 0 : i32
    %c0_i32_1 = arith.constant 0 : i32
    return %c0_i32, %c0_i32_0 : i32, i32
  }
  func.func @transform_2(%arg0: i32) -> (i32, i32) {
    %c0_i32 = arith.constant 0 : i32
    %c0_i32_0 = arith.constant 0 : i32
    %c0_i32_1 = arith.constant 0 : i32
    return %c0_i32, %c0_i32_0 : i32, i32
  }
  func.func @transform_3(%arg0: i32) -> (i32, i32) {
    %c0_i32 = arith.constant 0 : i32
    %c0_i32_0 = arith.constant 0 : i32
    %c0_i32_1 = arith.constant 0 : i32
    return %c0_i32, %c0_i32_0 : i32, i32
  }
  func.func @transform_4(%arg0: i32) -> (i32, i32) {
    %c0_i32 = arith.constant 0 : i32
    %c0_i32_0 = arith.constant 0 : i32
    %c0_i32_1 = arith.constant 0 : i32
    return %c0_i32, %c0_i32_0 : i32, i32
  }
  func.func @transform_5(%arg0: i32) -> (i32, i32) {
    %c0_i32 = arith.constant 0 : i32
    %c0_i32_0 = arith.constant 0 : i32
    %c0_i32_1 = arith.constant 0 : i32
    return %c0_i32, %c0_i32_0 : i32, i32
  }
  func.func @transform_6(%arg0: i32) -> (i32, i32) {
    %c0_i32 = arith.constant 0 : i32
    %c0_i32_0 = arith.constant 0 : i32
    %c0_i32_1 = arith.constant 0 : i32
    return %c0_i32, %c0_i32_0 : i32, i32
  }
  func.func @transform_7(%arg0: i32) -> (i32, i32) {
    %c0_i32 = arith.constant 0 : i32
    %c0_i32_0 = arith.constant 0 : i32
    return %arg0, %c0_i32 : i32, i32
  }
}

</mosaic_0001>

<bundles_post_ra>
// kernel: generator_forward.1
= control target key start
LH: loop header
LB: loop body
LE: loop exit
PB: predicated region body
PF: predicated region fallthrough
CT: control target
= control target key end

     0   :  { %vm55_vm0 = vcmask 1044480   ;;  %v444_v0 = vmov 0.0   ;;  %vm445_vm1 = vmmov 0   ;;  %vm51_vm2 = vcmask 211968   ;;  %s579_s1 = inlined_call_operand.vmem [shape: bf16[26,128], index: 1, kind: input, shape index: {}]   ;;  %s580_s0 = inlined_call_operand.vmem [shape: f32[8,26], index: 0, kind: input, shape index: {}]   ;;  %s581_s3 = inlined_call_operand.vmem [shape: bf16[128,128], index: 3, kind: input, shape index: {}]   ;;  %s582_s5 = inlined_call_operand.vmem [shape: bf16[128,2], index: 5, kind: input, shape index: {}]   ;;  %s583_s2 = inlined_call_operand.vmem [shape: f32[1,128], index: 2, kind: input, shape index: {}]   ;;  %s584_s4 = inlined_call_operand.vmem [shape: f32[1,128], index: 4, kind: input, shape index: {}]   ;;  %s585_s6 = inlined_call_operand.vmem [shape: f32[1,2], index: 6, kind: input, shape index: {}]   ;;  %s586_s7 = inlined_call_operand.vmem [shape: f32[8,2], index: 7, kind: output, shape index: {}]  }
   0x1   :  { %376 = vmatprep.subr.bf16.mxu0 %v444_v0  ;;  %v426_v1 = vld [vmem:[%s579_s1 + $0x8] sm:$0x1f]   ;;  %380 = vmatprep.mubr.msk.bf16.mxu0 %vm445_vm1, %v444_v0  ;;  %v427_v2 = vld [vmem:[%s579_s1] sm:$0xff]   ;;  %v428_v5 = vld [vmem:[%s581_s3 + $0x38] sm:$0xff]   ;;  %vm327_vm3 = vcmask 15360  }
   0x2   :  { %384 = vmatprep.subr.bf16.mxu1 %v444_v0  ;;  %400 = vmatprep.mubr.msk.bf16.mxu1 %vm445_vm1, %v444_v0  ;;  %v57_v3 = vsel %vm55_vm0, %v426_v1, 0  ;;  %v27_v4 = vld [vmem:[%s580_s0] sm:$0xff]  ;;  %v429_v6 = vld [vmem:[%s581_s3 + $0x30] sm:$0xff]   ;;  %v430_v8 = vld [vmem:[%s581_s3 + $0x28] sm:$0xff]  }
   0x3   :  { %377 = vmatpush3.bf16.msra.mxu0 %v57_v3  ;;  %385 = vmatpush3.bf16.msra.mxu1 %v428_v5  ;;  %v28_v7 = vpack.c.bf16 %v27_v4, %v27_v4  ;;  %v431_v9 = vld [vmem:[%s581_s3 + $0x20] sm:$0xff]   ;;  %v432_v10 = vld [vmem:[%s581_s3 + $0x18] sm:$0xff]   ;;  %v433_v11 = vld [vmem:[%s581_s3 + $0x10] sm:$0xff]  }
   0x4   :  { %378 = vmatprep.subr.bf16.mxu0 %v444_v0  ;;  %386 = vmatprep.subr.bf16.mxu1 %v444_v0  ;;  %v434_v12 = vld [vmem:[%s581_s3 + $0x8] sm:$0xff]   ;;  %v435_v13 = vld [vmem:[%s581_s3] sm:$0xff]   ;;  %v436_v14 = vld [vmem:[%s582_s5 + $0x38] sm:$0xff]  }
   0x5   :  { %v437_v15 = vld [vmem:[%s582_s5 + $0x30] sm:$0xff]   ;;  %v438_v16 = vld [vmem:[%s582_s5 + $0x28] sm:$0xff]   ;;  %v439_v17 = vld [vmem:[%s582_s5 + $0x20] sm:$0xff]  }
   0x6   :  { %v440_v18 = vld [vmem:[%s582_s5 + $0x18] sm:$0xff]   ;;  %v441_v19 = vld [vmem:[%s582_s5 + $0x10] sm:$0xff]   ;;  %v333_v20 = vld [vmem:[%s583_s2] ss:$0 sm:$0xff] }
   0x7   :  { %379 = vmatpush3.bf16.msra.mxu0 %v427_v2  ;;  %387 = vmatpush3.bf16.msra.mxu1 %v429_v6  ;;  %v442_v29 = vld [vmem:[%s582_s5 + $0x8] sm:$0xff]   ;;  %v443_v30 = vld [vmem:[%s582_s5] sm:$0xff]  }
   0x8   :  { %404 = vmatprep.subr.bf16.mxu0 %v444_v0  ;;  %388 = vmatprep.subr.bf16.mxu1 %v444_v0  ;;  %v337_v31 = vld [vmem:[%s584_s4] ss:$0 sm:$0xff] }
   0x9   :  { %v346_v40 = vld [vmem:[%s585_s6] ss:$0 sm:$0xff] }
   0xa   :  { %381 = vmatmul.mubr.msk.bf16.vlgmr.msra.gmra.mxu0 %vm51_vm2, %v28_v7 }
   0xb   :  { %420 = vmatprep.mubr.msk.bf16.mxu0 %vm445_vm1, %v444_v0  ;;  %389 = vmatpush3.bf16.msra.mxu1 %v430_v8 }
   0xc   :  { %390 = vmatprep.subr.bf16.mxu1 %v444_v0  ;;  %405 = vmatpush3.bf16.msra.mxu0 %v436_v14 }
   0xd   :  { %406 = vmatprep.subr.bf16.mxu0 %v444_v0 }
   0xf   :  { %391 = vmatpush3.bf16.msra.mxu1 %v431_v9 }
  0x10   :  { %392 = vmatprep.subr.bf16.mxu1 %v444_v0  ;;  %407 = vmatpush3.bf16.msra.mxu0 %v437_v15 }
  0x11   :  { %408 = vmatprep.subr.bf16.mxu0 %v444_v0 }
  0x13   :  { %393 = vmatpush3.bf16.msra.mxu1 %v432_v10 }
  0x14   :  { %394 = vmatprep.subr.bf16.mxu1 %v444_v0  ;;  %409 = vmatpush3.bf16.msra.mxu0 %v438_v16 }
  0x15   :  { %410 = vmatprep.subr.bf16.mxu0 %v444_v0 }
  0x17   :  { %395 = vmatpush3.bf16.msra.mxu1 %v433_v11 }
  0x18   :  { %396 = vmatprep.subr.bf16.mxu1 %v444_v0  ;;  %411 = vmatpush3.bf16.msra.mxu0 %v439_v17 }
  0x19   :  { %412 = vmatprep.subr.bf16.mxu0 %v444_v0 }
  0x1b   :  { %397 = vmatpush3.bf16.msra.mxu1 %v434_v12 }
  0x1c   :  { %398 = vmatprep.subr.bf16.mxu1 %v444_v0  ;;  %413 = vmatpush3.bf16.msra.mxu0 %v440_v18 }
  0x1d   :  { %414 = vmatprep.subr.bf16.mxu0 %v444_v0 }
  0x1f   :  { %399 = vmatpush3.bf16.msra.mxu1 %v435_v13 }
  0x20   :  { %415 = vmatpush3.bf16.msra.mxu0 %v441_v19 }
  0x21   :  { %416 = vmatprep.subr.bf16.mxu0 %v444_v0 }
  0x24   :  { %417 = vmatpush3.bf16.msra.mxu0 %v442_v29 }
  0x25   :  { %418 = vmatprep.subr.bf16.mxu0 %v444_v0 }
  0x28   :  { %419 = vmatpush3.bf16.msra.mxu0 %v443_v30 }
  0xca   :  { %v93_v21 = vpop.f32.mrf.mxu0 }
  0xcb   :  { %v94_v22 = vadd.f32 %v333_v20, %v93_v21 }
  0xcc   :  { %v382_v23 = vpop.f32.mrf.mxu0 }
  0xcd   :  { %v99_v24 = vmul.f32 0.01, %v94_v22 }
  0xce   :  { %v96_v25 = vpop.f32.mrf.mxu0 }
  0xcf   :  { %v100_v26 = vmax.f32 %v94_v22, %v99_v24 }
  0xd0   :  { %v383_v27 = vpop.f32.mrf.mxu0 }
  0xd1   :  { %v101_v28 = vpack.c.bf16 %v100_v26, %v100_v26 }
  0xd3   :  { %401 = vmatmul.mubr.bf16.vlgmr.msra.gmra.mxu1 %v101_v28 }
 0x193   :  { %v207_v32 = vpop.f32.mrf.mxu1 }
 0x194   :  { %v208_v33 = vadd.f32 %v337_v31, %v207_v32 }
 0x195   :  { %v402_v34 = vpop.f32.mrf.mxu1 }
 0x196   :  { %v213_v35 = vmul.f32 0.01, %v208_v33 }
 0x197   :  { %v210_v36 = vpop.f32.mrf.mxu1 }
 0x198   :  { %v214_v37 = vmax.f32 %v208_v33, %v213_v35 }
 0x199   :  { %v403_v38 = vpop.f32.mrf.mxu1 }
 0x19a   :  { %v215_v39 = vpack.c.bf16 %v214_v37, %v214_v37 }
 0x19c   :  { %421 = vmatmul.mubr.bf16.vlgmr.msra.gmra.mxu0 %v215_v39 }
 0x25c   :  { %v321_v41 = vpop.f32.mrf.mxu0 }
 0x25d   :  { %v322_v42 = vadd.f32 %v346_v40, %v321_v41 }
 0x25e   :  { %v422_v43 = vpop.f32.mrf.mxu0 }
 0x25f   :  { %328 = vst.msk [vmem:[%s586_s7] sm:$0xff] %vm327_vm3, %v322_v42 }
 0x260   :  { %v324_v44 = vpop.f32.mrf.mxu0 }
 0x262   :  { %v423_v45 = vpop.f32.mrf.mxu0 }

</bundles_post_ra>
